<compile_context>
chip_gen: v5e
topology: v5e:2x2
jax: 0.10.0
libtpu: 0.0.40
codegen_flags: <defaults>
</compile_context>

<pallas_src>
import functools
import math

import jax
import jax.numpy as jnp
from jax.experimental import pallas as pl
from jax.experimental.pallas import tpu as pltpu

IN_DIM = 111
IN_DIM_PAD = 128          # lane-aligned contraction dim for fc1
HID_DIM = 256
ACT_DIM = 8
HEAD_DIM = 2 * ACT_DIM    # fused mu || std heads
LOG_SQRT_2PI = 0.5 * math.log(2.0 * math.pi)


def policy_kernel(state_ref, w1_ref, b1_ref, wh_ref, bh_ref, eps_ref, out_ref):
    # --- fc1 + ReLU  (K padded to 128, zeros contribute nothing) ----------
    x = state_ref[...]
    h1 = jnp.dot(x, w1_ref[...], preferred_element_type=jnp.float32) + b1_ref[...]
    h1 = jnp.maximum(h1, 0.0)

    # --- fused heads: one (256, 16) matmul, then static column slices -----
    heads = jnp.dot(h1, wh_ref[...], preferred_element_type=jnp.float32) + bh_ref[...]
    mu = heads[:, :ACT_DIM]
    pre_std = heads[:, ACT_DIM:]
    # softplus (PyTorch-style threshold, numerically stable)
    std = jnp.where(pre_std > 20.0, pre_std, jnp.log1p(jnp.exp(pre_std)))

    # --- reparameterized Normal sample + log_prob --------------------------
    eps = eps_ref[...]
    action_raw = mu + std * eps                      # dist.rsample()
    # Normal.log_prob(action_raw): (action_raw - mu) == std * eps exactly,
    # so -((a-mu)^2)/(2*std^2) simplifies to -0.5*eps^2 (no divide, no var).
    log_prob = -0.5 * eps * eps - jnp.log(std) - LOG_SQRT_2PI

    tanh_a = jnp.tanh(action_raw)
    log_prob = log_prob - jnp.log(1.0 - tanh_a * tanh_a + 1e-07)

    # single lane-denser output slab: [action | log_prob]
    out_ref[...] = jnp.concatenate([tanh_a, log_prob], axis=-1)


def prepare_params(params):
    """One-time host-side packing: pad fc1 rows to K=128, fuse mu/std heads."""
    w1p = jnp.pad(params["w1"], ((0, IN_DIM_PAD - IN_DIM), (0, 0)))     # (128, 256)
    wh = jnp.concatenate([params["wmu"], params["wstd"]], axis=1)       # (256, 16)
    bh = jnp.concatenate([params["bmu"], params["bstd"]], axis=1)       # (1, 16)
    return {"w1p": w1p, "b1": params["b1"], "wh": wh, "bh": bh}


@functools.partial(jax.jit, static_argnames=("tile_b",))
def policy_forward(state, packed, eps, tile_b=512):
    """PolicyNet forward.

    state : (B, 111) f32,  eps : (B, 8) f32 standard-normal noise
    packed: output of prepare_params()
    returns (action, log_prob), each (B, 8) f32
    """
    B = state.shape[0]
    # batch tile: multiple of 8 (sublane), capped at tile_b; batch padded to a
    # multiple of the tile so the grid divides evenly.
    tb = min(tile_b, ((B + 7) // 8) * 8)
    tb = ((tb + 7) // 8) * 8
    B_pad = ((B + tb - 1) // tb) * tb
    grid = (B_pad // tb,)

    state_p = jnp.pad(state, ((0, B_pad - B), (0, IN_DIM_PAD - IN_DIM)))
    eps_p = jnp.pad(eps, ((0, B_pad - B), (0, 0)))

    resident = lambda shape: pl.BlockSpec(shape, lambda i: (0, 0))

    out = pl.pallas_call(
        policy_kernel,
        out_shape=jax.ShapeDtypeStruct((B_pad, HEAD_DIM), jnp.float32),
        grid_spec=pl.GridSpec(
            grid=grid,
            in_specs=[
                pl.BlockSpec((tb, IN_DIM_PAD), lambda i: (i, 0)),   # state tile
                resident((IN_DIM_PAD, HID_DIM)),                    # w1 (stays in VMEM)
                resident((1, HID_DIM)),                             # b1
                resident((HID_DIM, HEAD_DIM)),                      # fused head weights
                resident((1, HEAD_DIM)),                            # fused head bias
                pl.BlockSpec((tb, ACT_DIM), lambda i: (i, 0)),      # eps tile
            ],
            out_specs=pl.BlockSpec((tb, HEAD_DIM), lambda i: (i, 0)),
        ),
        compiler_params=pltpu.CompilerParams(
            dimension_semantics=("parallel",),      # v7x: shard batch tiles over both TCs
        ),
    )(state_p, packed["w1p"], packed["b1"], packed["wh"], packed["bh"], eps_p)

    action = out[:B, :ACT_DIM]
    log_prob = out[:B, ACT_DIM:]
    return action, log_prob


def init_params(key):
    """Deterministic init mimicking nn.Linear's uniform(-1/sqrt(fan_in), +)."""
    ks = jax.random.split(key, 6)

    def lin(kw, kb, fan_in, fan_out):
        bound = 1.0 / math.sqrt(fan_in)
        w = jax.random.uniform(kw, (fan_in, fan_out), jnp.float32, -bound, bound)
        b = jax.random.uniform(kb, (1, fan_out), jnp.float32, -bound, bound)
        return w, b

    w1, b1 = lin(ks[0], ks[1], IN_DIM, HID_DIM)
    wmu, bmu = lin(ks[2], ks[3], HID_DIM, ACT_DIM)
    wstd, bstd = lin(ks[4], ks[5], HID_DIM, ACT_DIM)
    return {"w1": w1, "b1": b1, "wmu": wmu, "bmu": bmu,
            "wstd": wstd, "bstd": bstd}


def reference_forward(state, params, eps):
    """Pure-JAX reference (mirrors the PyTorch module)."""
    h1 = jax.nn.relu(state @ params["w1"] + params["b1"])
    mu = h1 @ params["wmu"] + params["bmu"]
    std = jax.nn.softplus(h1 @ params["wstd"] + params["bstd"])
    a_raw = mu + std * eps
    lp = (-((a_raw - mu) ** 2) / (2.0 * std * std)
          - jnp.log(std) - LOG_SQRT_2PI)
    lp = lp - jnp.log(1.0 - jnp.tanh(a_raw) ** 2 + 1e-07)
    return jnp.tanh(a_raw), lp


# TODO(synk): train_net / Adam optimizers / log_alpha temperature update are
# training-side logic, not part of the forward pass, and are not implemented.

if __name__ == "__main__":
    key = jax.random.PRNGKey(0)
    k_params, k_state, k_eps = jax.random.split(key, 3)

    B = 2
    params = init_params(k_params)
    packed = prepare_params(params)
    state = jax.random.normal(k_state, (B, IN_DIM), jnp.float32)
    eps = jax.random.normal(k_eps, (B, ACT_DIM), jnp.float32)

    action, log_prob = policy_forward(state, packed, eps)
    action = jax.block_until_ready(action)
    log_prob = jax.block_until_ready(log_prob)

    ref_action, ref_logp = reference_forward(state, params, eps)
    assert action.shape == (B, ACT_DIM) and log_prob.shape == (B, ACT_DIM)
    assert jnp.allclose(action, ref_action, atol=1e-5, rtol=1e-5)
    assert jnp.allclose(log_prob, ref_logp, atol=1e-4, rtol=1e-4)

    print("KERNEL_OK")
</pallas_src>

<mosaic_0001>
module attributes {stable_mosaic.version = 11 : i64} {
  func.func @policy_kernel(%arg0: i32, %arg1: memref<8x128xf32, #tpu.memory_space<vmem>>, %arg2: memref<128x256xf32, #tpu.memory_space<vmem>>, %arg3: memref<1x256xf32, #tpu.memory_space<vmem>>, %arg4: memref<256x16xf32, #tpu.memory_space<vmem>>, %arg5: memref<1x16xf32, #tpu.memory_space<vmem>>, %arg6: memref<8x8xf32, #tpu.memory_space<vmem>>, %arg7: memref<8x16xf32, #tpu.memory_space<vmem>>) attributes {dimension_semantics = [#tpu.dimension_semantics<parallel>], iteration_bounds = array<i64: 1>, scalar_prefetch = 0 : i64, scratch_operands = 0 : i64, tpu.core_type = #tpu.core_type<tc>, window_params = [{transform_indices = @transform_0, window_bounds = array<i64: 8, 128>}, {pipeline_mode = #tpu.pipeline_mode<synchronous>, transform_indices = @transform_1, window_bounds = array<i64: 128, 256>}, {pipeline_mode = #tpu.pipeline_mode<synchronous>, transform_indices = @transform_2, window_bounds = array<i64: 1, 256>}, {pipeline_mode = #tpu.pipeline_mode<synchronous>, transform_indices = @transform_3, window_bounds = array<i64: 256, 16>}, {pipeline_mode = #tpu.pipeline_mode<synchronous>, transform_indices = @transform_4, window_bounds = array<i64: 1, 16>}, {transform_indices = @transform_5, window_bounds = array<i64: 8, 8>}, {transform_indices = @transform_6, window_bounds = array<i64: 8, 16>}]} {
    %c0 = arith.constant 0 : index
    %c0_0 = arith.constant 0 : index
    %0 = vector.load %arg1[%c0, %c0_0] : memref<8x128xf32, #tpu.memory_space<vmem>>, vector<8x128xf32>
    %c0_1 = arith.constant 0 : index
    %c0_2 = arith.constant 0 : index
    %1 = vector.load %arg2[%c0_1, %c0_2] : memref<128x256xf32, #tpu.memory_space<vmem>>, vector<128x256xf32>
    %cst = arith.constant dense<0.000000e+00> : vector<8x256xf32>
    %2 = tpu.matmul %0, %1, %cst {dimension_numbers = #tpu.dot_dimension_numbers<[1], [0], [0], [1], [0, 0, 1, 1], [], []>} : vector<8x128xf32>, vector<128x256xf32>, vector<8x256xf32> -> vector<8x256xf32>
    %c0_3 = arith.constant 0 : index
    %c0_4 = arith.constant 0 : index
    %3 = vector.load %arg3[%c0_3, %c0_4] : memref<1x256xf32, #tpu.memory_space<vmem>>, vector<1x256xf32>
    %4 = vector.broadcast %3 : vector<1x256xf32> to vector<8x256xf32>
    %5 = arith.addf %2, %4 : vector<8x256xf32>
    %cst_5 = arith.constant 0.000000e+00 : f32
    %6 = vector.broadcast %cst_5 : f32 to vector<8x256xf32>
    %7 = arith.maximumf %5, %6 : vector<8x256xf32>
    %c0_6 = arith.constant 0 : index
    %c0_7 = arith.constant 0 : index
    %8 = vector.load %arg4[%c0_6, %c0_7] : memref<256x16xf32, #tpu.memory_space<vmem>>, vector<256x16xf32>
    %cst_8 = arith.constant dense<0.000000e+00> : vector<8x16xf32>
    %9 = tpu.matmul %7, %8, %cst_8 {dimension_numbers = #tpu.dot_dimension_numbers<[1], [0], [0], [1], [0, 0, 1, 1], [], []>} : vector<8x256xf32>, vector<256x16xf32>, vector<8x16xf32> -> vector<8x16xf32>
    %c0_9 = arith.constant 0 : index
    %c0_10 = arith.constant 0 : index
    %10 = vector.load %arg5[%c0_9, %c0_10] : memref<1x16xf32, #tpu.memory_space<vmem>>, vector<1x16xf32>
    %11 = vector.broadcast %10 : vector<1x16xf32> to vector<8x16xf32>
    %12 = arith.addf %9, %11 : vector<8x16xf32>
    %13 = vector.extract_strided_slice %12 {offsets = [0, 0], sizes = [8, 8], strides = [1, 1]} : vector<8x16xf32> to vector<8x8xf32>
    %14 = vector.extract_strided_slice %12 {offsets = [0, 8], sizes = [8, 8], strides = [1, 1]} : vector<8x16xf32> to vector<8x8xf32>
    %cst_11 = arith.constant 2.000000e+01 : f32
    %15 = vector.broadcast %cst_11 : f32 to vector<8x8xf32>
    %16 = arith.cmpf ogt, %14, %15 : vector<8x8xf32>
    %17 = math.exp %14 : vector<8x8xf32>
    %18 = math.log1p %17 : vector<8x8xf32>
    %19 = arith.select %16, %14, %18 : vector<8x8xi1>, vector<8x8xf32>
    %c0_12 = arith.constant 0 : index
    %c0_13 = arith.constant 0 : index
    %20 = vector.load %arg6[%c0_12, %c0_13] : memref<8x8xf32, #tpu.memory_space<vmem>>, vector<8x8xf32>
    %21 = arith.mulf %19, %20 : vector<8x8xf32>
    %22 = arith.addf %13, %21 : vector<8x8xf32>
    %cst_14 = arith.constant -5.000000e-01 : f32
    %23 = vector.broadcast %cst_14 : f32 to vector<8x8xf32>
    %24 = arith.mulf %23, %20 : vector<8x8xf32>
    %25 = arith.mulf %24, %20 : vector<8x8xf32>
    %26 = math.log %19 : vector<8x8xf32>
    %27 = arith.subf %25, %26 : vector<8x8xf32>
    %cst_15 = arith.constant 0.918938517 : f32
    %28 = vector.broadcast %cst_15 : f32 to vector<8x8xf32>
    %29 = arith.subf %27, %28 : vector<8x8xf32>
    %30 = math.tanh %22 : vector<8x8xf32>
    %31 = arith.mulf %30, %30 : vector<8x8xf32>
    %cst_16 = arith.constant 1.000000e+00 : f32
    %32 = vector.broadcast %cst_16 : f32 to vector<8x8xf32>
    %33 = arith.subf %32, %31 : vector<8x8xf32>
    %cst_17 = arith.constant 1.000000e-07 : f32
    %34 = vector.broadcast %cst_17 : f32 to vector<8x8xf32>
    %35 = arith.addf %33, %34 : vector<8x8xf32>
    %36 = math.log %35 : vector<8x8xf32>
    %37 = arith.subf %29, %36 : vector<8x8xf32>
    %38 = tpu.concatenate %30, %37 in 1 : vector<8x8xf32>, vector<8x8xf32> -> vector<8x16xf32>
    %c0_18 = arith.constant 0 : index
    %c0_19 = arith.constant 0 : index
    %39 = vector.load %arg7[%c0_18, %c0_19] : memref<8x16xf32, #tpu.memory_space<vmem>>, vector<8x16xf32>
    tpu.vector_store %arg7[%c0_18, %c0_19], %38 {strides = array<i32>} : memref<8x16xf32, #tpu.memory_space<vmem>>, vector<8x16xf32>,
    return
  }
  func.func @transform_0(%arg0: i32) -> (i32, i32) {
    %c0_i32 = arith.constant 0 : i32
    %c0_i32_0 = arith.constant 0 : i32
    return %arg0, %c0_i32 : i32, i32
  }
  func.func @transform_1(%arg0: i32) -> (i32, i32) {
    %c0_i32 = arith.constant 0 : i32
    %c0_i32_0 = arith.constant 0 : i32
    %c0_i32_1 = arith.constant 0 : i32
    return %c0_i32, %c0_i32_0 : i32, i32
  }
  func.func @transform_2(%arg0: i32) -> (i32, i32) {
    %c0_i32 = arith.constant 0 : i32
    %c0_i32_0 = arith.constant 0 : i32
    %c0_i32_1 = arith.constant 0 : i32
    return %c0_i32, %c0_i32_0 : i32, i32
  }
  func.func @transform_3(%arg0: i32) -> (i32, i32) {
    %c0_i32 = arith.constant 0 : i32
    %c0_i32_0 = arith.constant 0 : i32
    %c0_i32_1 = arith.constant 0 : i32
    return %c0_i32, %c0_i32_0 : i32, i32
  }
  func.func @transform_4(%arg0: i32) -> (i32, i32) {
    %c0_i32 = arith.constant 0 : i32
    %c0_i32_0 = arith.constant 0 : i32
    %c0_i32_1 = arith.constant 0 : i32
    return %c0_i32, %c0_i32_0 : i32, i32
  }
  func.func @transform_5(%arg0: i32) -> (i32, i32) {
    %c0_i32 = arith.constant 0 : i32
    %c0_i32_0 = arith.constant 0 : i32
    return %arg0, %c0_i32 : i32, i32
  }
  func.func @transform_6(%arg0: i32) -> (i32, i32) {
    %c0_i32 = arith.constant 0 : i32
    %c0_i32_0 = arith.constant 0 : i32
    return %arg0, %c0_i32 : i32, i32
  }
}

</mosaic_0001>

<bundles_post_ra>
// kernel: policy_forward.1
= control target key start
LH: loop header
LB: loop body
LE: loop exit
PB: predicated region body
PF: predicated region fallthrough
CT: control target
= control target key end

     0   :  { %s247_s7 = smov 8   ;;  %vm225_vm2 = vcmask 64512   ;;  %vm227_vm3 = vcmask 130048   ;;  %s493_s1 = inlined_call_operand.vmem [shape: f32[128,256], index: 1, kind: input, shape index: {}]   ;;  %s494_s3 = inlined_call_operand.vmem [shape: f32[256,16], index: 3, kind: input, shape index: {}]   ;;  %s495_s0 = inlined_call_operand.vmem [shape: f32[8,128], index: 0, kind: input, shape index: {}]   ;;  %s496_s4 = inlined_call_operand.vmem [shape: f32[1,16], index: 4, kind: input, shape index: {}]   ;;  %s497_s5 = inlined_call_operand.vmem [shape: f32[8,8], index: 5, kind: input, shape index: {}]   ;;  %s498_s2 = inlined_call_operand.vmem [shape: f32[1,256], index: 2, kind: input, shape index: {}]   ;;  %s499_s6 = inlined_call_operand.vmem [shape: f32[8,16], index: 6, kind: output, shape index: {}]  }
   0x1   :  { %v54_v0 = vld [vmem:[%s493_s1 + $0xf0] sm:$0xff]  ;;  %v52_v1 = vld [vmem:[%s493_s1 + $0xe0] sm:$0xff]  ;;  %v55_v2 = vld [vmem:[%s493_s1 + $0xf8] sm:$0xff] }
   0x2   :  { %62 = vmatpush.msra.mxu0 %v54_v0  ;;  %82 = vmatpush.msra.mxu1 %v55_v2  ;;  %v53_v3 = vld [vmem:[%s493_s1 + $0xe8] sm:$0xff]  ;;  %v50_v4 = vld [vmem:[%s493_s1 + $0xd0] sm:$0xff]  ;;  %v51_v5 = vld [vmem:[%s493_s1 + $0xd8] sm:$0xff] }
   0x3   :  { %v48_v6 = vld [vmem:[%s493_s1 + $0xc0] sm:$0xff]  ;;  %v49_v7 = vld [vmem:[%s493_s1 + $0xc8] sm:$0xff]  ;;  %v46_v8 = vld [vmem:[%s493_s1 + $0xb0] sm:$0xff] }
   0x4   :  { %63 = vmatpush.msra.mxu0 %v52_v1  ;;  %83 = vmatpush.msra.mxu1 %v53_v3  ;;  %v47_v9 = vld [vmem:[%s493_s1 + $0xb8] sm:$0xff]  ;;  %v44_v10 = vld [vmem:[%s493_s1 + $0xa0] sm:$0xff]  ;;  %v45_v11 = vld [vmem:[%s493_s1 + $0xa8] sm:$0xff] }
   0x5   :  { %v42_v12 = vld [vmem:[%s493_s1 + $0x90] sm:$0xff]  ;;  %v43_v13 = vld [vmem:[%s493_s1 + $0x98] sm:$0xff]  ;;  %v40_v17 = vld [vmem:[%s493_s1 + $0x80] sm:$0xff] }
   0x6   :  { %64 = vmatpush.msra.mxu0 %v50_v4  ;;  %84 = vmatpush.msra.mxu1 %v51_v5  ;;  %v119_v14 = vld [vmem:[%s494_s3 + $0x78] sm:$0xff]  ;;  %v118_v15 = vld [vmem:[%s494_s3 + $0x70] sm:$0xff]  ;;  %v41_v18 = vld [vmem:[%s493_s1 + $0x88] sm:$0xff] }
   0x7   :  { %v135_v16 = vld [vmem:[%s494_s3 + $0xf8] sm:$0xff]  ;;  %140 = vmatpush.msra.mxu2 %v119_v14  ;;  %v134_v19 = vld [vmem:[%s494_s3 + $0xf0] sm:$0xff]  ;;  %v117_v20 = vld [vmem:[%s494_s3 + $0x68] sm:$0xff] }
   0x8   :  { %65 = vmatpush.msra.mxu0 %v48_v6  ;;  %85 = vmatpush.msra.mxu1 %v49_v7  ;;  %v133_v21 = vld [vmem:[%s494_s3 + $0xe8] sm:$0xff]  ;;  %v38_v22 = vld [vmem:[%s493_s1 + $0x70] sm:$0xff]  ;;  %v39_v23 = vld [vmem:[%s493_s1 + $0x78] sm:$0xff] }
   0x9   :  { %160 = vmatpush.msra.mxu3 %v135_v16  ;;  %141 = vmatpush.msra.mxu2 %v118_v15  ;;  %v116_v24 = vld [vmem:[%s494_s3 + $0x60] sm:$0xff]  ;;  %v37_v27 = vld [vmem:[%s493_s1 + $0x68] sm:$0xff]  ;;  %v115_v28 = vld [vmem:[%s494_s3 + $0x58] sm:$0xff] }
   0xa   :  { %66 = vmatpush.msra.mxu0 %v46_v8  ;;  %86 = vmatpush.msra.mxu1 %v47_v9  ;;  %v132_v25 = vld [vmem:[%s494_s3 + $0xe0] sm:$0xff]  ;;  %v131_v29 = vld [vmem:[%s494_s3 + $0xd8] sm:$0xff]  ;;  %v34_v30 = vld [vmem:[%s493_s1 + $0x50] sm:$0xff] }
   0xb   :  { %161 = vmatpush.msra.mxu3 %v134_v19  ;;  %v36_v26 = vld [vmem:[%s493_s1 + $0x60] sm:$0xff]  ;;  %142 = vmatpush.msra.mxu2 %v117_v20  ;;  %v35_v31 = vld [vmem:[%s493_s1 + $0x58] sm:$0xff]  ;;  %v114_v32 = vld [vmem:[%s494_s3 + $0x50] sm:$0xff] }
   0xc   :  { %67 = vmatpush.msra.mxu0 %v44_v10  ;;  %87 = vmatpush.msra.mxu1 %v45_v11  ;;  %v130_v33 = vld [vmem:[%s494_s3 + $0xd0] sm:$0xff]  ;;  %v32_v34 = vld [vmem:[%s493_s1 + $0x40] sm:$0xff]  ;;  %v33_v35 = vld [vmem:[%s493_s1 + $0x48] sm:$0xff] }
   0xd   :  { %162 = vmatpush.msra.mxu3 %v133_v21  ;;  %143 = vmatpush.msra.mxu2 %v116_v24  ;;  %v113_v36 = vld [vmem:[%s494_s3 + $0x48] sm:$0xff]  ;;  %v30_v38 = vld [vmem:[%s493_s1 + $0x30] sm:$0xff]  ;;  %v31_v39 = vld [vmem:[%s493_s1 + $0x38] sm:$0xff] }
   0xe   :  { %68 = vmatpush.msra.mxu0 %v42_v12  ;;  %88 = vmatpush.msra.mxu1 %v43_v13  ;;  %v129_v37 = vld [vmem:[%s494_s3 + $0xc8] sm:$0xff]  ;;  %v112_v40 = vld [vmem:[%s494_s3 + $0x40] sm:$0xff]  ;;  %v111_v44 = vld [vmem:[%s494_s3 + $0x38] sm:$0xff] }
   0xf   :  { %163 = vmatpush.msra.mxu3 %v132_v25  ;;  %144 = vmatpush.msra.mxu2 %v115_v28  ;;  %v128_v41 = vld [vmem:[%s494_s3 + $0xc0] sm:$0xff]  ;;  %v29_v43 = vld [vmem:[%s493_s1 + $0x28] sm:$0xff]  ;;  %v127_v45 = vld [vmem:[%s494_s3 + $0xb8] sm:$0xff] }
  0x10   :  { %69 = vmatpush.msra.mxu0 %v40_v17  ;;  %89 = vmatpush.msra.mxu1 %v41_v18  ;;  %v28_v42 = vld [vmem:[%s493_s1 + $0x20] sm:$0xff]  ;;  %v26_v46 = vld [vmem:[%s493_s1 + $0x10] sm:$0xff]  ;;  %v27_v47 = vld [vmem:[%s493_s1 + $0x18] sm:$0xff] }
  0x11   :  { %164 = vmatpush.msra.mxu3 %v131_v29  ;;  %145 = vmatpush.msra.mxu2 %v114_v32  ;;  %v110_v48 = vld [vmem:[%s494_s3 + $0x30] sm:$0xff]  ;;  %v24_v50 = vld [vmem:[%s493_s1] sm:$0xff]  ;;  %v25_v51 = vld [vmem:[%s493_s1 + $0x8] sm:$0xff] }
  0x12   :  { %70 = vmatpush.msra.mxu0 %v38_v22  ;;  %90 = vmatpush.msra.mxu1 %v39_v23  ;;  %v126_v49 = vld [vmem:[%s494_s3 + $0xb0] sm:$0xff]  ;;  %v23_v52 = vld [vmem:[%s495_s0] sm:$0xff]  ;;  %v109_v53 = vld [vmem:[%s494_s3 + $0x28] sm:$0xff] }
  0x13   :  { %165 = vmatpush.msra.mxu3 %v130_v33  ;;  %146 = vmatpush.msra.mxu2 %v113_v36  ;;  %v125_v54 = vld [vmem:[%s494_s3 + $0xa8] sm:$0xff]  ;;  %v108_v55 = vld [vmem:[%s494_s3 + $0x20] sm:$0xff]  ;;  %v107_v57 = vld [vmem:[%s494_s3 + $0x18] sm:$0xff] }
  0x14   :  { %71 = vmatpush.msra.mxu0 %v36_v26  ;;  %91 = vmatpush.msra.mxu1 %v37_v27  ;;  %v124_v56 = vld [vmem:[%s494_s3 + $0xa0] sm:$0xff]  ;;  %v106_v58 = vld [vmem:[%s494_s3 + $0x10] sm:$0xff]  ;;  %v123_v59 = vld [vmem:[%s494_s3 + $0x98] sm:$0xff] }
  0x15   :  { %166 = vmatpush.msra.mxu3 %v129_v37  ;;  %147 = vmatpush.msra.mxu2 %v112_v40  ;;  %v105_v60 = vld [vmem:[%s494_s3 + $0x8] sm:$0xff]  ;;  %v122_v61 = vld [vmem:[%s494_s3 + $0x90] sm:$0xff]  ;;  %v104_v62 = vld [vmem:[%s494_s3] sm:$0xff] }
  0x16   :  { %72 = vmatpush.msra.mxu0 %v34_v30  ;;  %92 = vmatpush.msra.mxu1 %v35_v31  ;;  %v121_v63 = vld [vmem:[%s494_s3 + $0x88] sm:$0xff]  ;;  %v120_v0 = vld [vmem:[%s494_s3 + $0x80] sm:$0xff] }
  0x17   :  { %167 = vmatpush.msra.mxu3 %v128_v41  ;;  %148 = vmatpush.msra.mxu2 %v111_v44  ;;  %v193_v1 = vld [vmem:[%s497_s5] sm:$0xff] }
  0x18   :  { %73 = vmatpush.msra.mxu0 %v32_v34  ;;  %93 = vmatpush.msra.mxu1 %v33_v35  ;;  %v56_v2 = vld [vmem:[%s498_s2] sm:$0x3]  ;;  %s248_s2 = smov 120   ;;  %v204_v35 = vmul.f32 -0.5, %v193_v1 }
  0x19   :  { %168 = vmatpush.msra.mxu3 %v127_v45  ;;  %149 = vmatpush.msra.mxu2 %v110_v48  ;;  %v58_v3 = vperm.slane %v56_v2, 0  ;;  %v59_v4 = vperm.slane %v56_v2, 1  ;;  %v236_v11 = vld [vmem:[%s496_s4] ss:$0 sm:$0xff] }
  0x1a   :  { %74 = vmatpush.msra.mxu0 %v30_v38  ;;  %94 = vmatpush.msra.mxu1 %v31_v39  ;;  %v205_v38 = vmul.f32 %v204_v35, %v193_v1 }
  0x1b   :  { %169 = vmatpush.msra.mxu3 %v126_v49  ;;  %150 = vmatpush.msra.mxu2 %v109_v53 }
  0x1c   :  { %75 = vmatpush.msra.mxu0 %v28_v42  ;;  %95 = vmatpush.msra.mxu1 %v29_v43 }
  0x1d   :  { %170 = vmatpush.msra.mxu3 %v125_v54  ;;  %151 = vmatpush.msra.mxu2 %v108_v55 }
  0x1e   :  { %76 = vmatpush.msra.mxu0 %v26_v46  ;;  %96 = vmatpush.msra.mxu1 %v27_v47 }
  0x1f   :  { %171 = vmatpush.msra.mxu3 %v124_v56  ;;  %152 = vmatpush.msra.mxu2 %v107_v57 }
  0x20   :  { %77 = vmatpush.msra.mxu0 %v24_v50  ;;  %97 = vmatpush.msra.mxu1 %v25_v51 }
  0x21   :  { %78 = vmatmul.f32.vlgmr.msra.gmra.mxu0 %v23_v52  ;;  %98 = vmatmul.f32.vlgmr.msra.gmra.mxu1 %v23_v52 }
  0x22   :  { %153 = vmatpush.msra.mxu2 %v106_v58  ;;  %172 = vmatpush.msra.mxu3 %v123_v59 }
  0x23   :  { %195 = vrot.lane.b32.xlu0 %v193_v1, %s247_s7 }
  0x24   :  { %154 = vmatpush.msra.mxu2 %v105_v60  ;;  %173 = vmatpush.msra.mxu3 %v122_v61 }
  0x26   :  { %155 = vmatpush.msra.mxu2 %v104_v62  ;;  %174 = vmatpush.msra.mxu3 %v121_v63 }
  0x28   :  { %175 = vmatpush.msra.mxu3 %v120_v0 }
  0x95   :  { %v196_v25 = vpop.permute.xlu0 %195 }
  0x9e   :  { %v79_v5 = vpop.f32.mrf.mxu0  ;;  %v99_v6 = vpop.f32.mrf.mxu1 }
  0x9f   :  { %v80_v7 = vadd.f32 %v79_v5, %v58_v3  ;;  %v100_v8 = vadd.f32 %v99_v6, %v59_v4 }
  0xa1   :  { %v102_v9 = vmax.f32 %v80_v7, 0.0  ;;  %v103_v10 = vmax.f32 %v100_v8, 0.0 }
  0xa3   :  { %156 = vmatmul.f32.vlgmr.msra.gmra.mxu2 %v102_v9  ;;  %176 = vmatmul.f32.vlgmr.msra.gmra.mxu3 %v103_v10 }
 0x126   :  { %v157_v12 = vpop.f32.mrf.mxu2  ;;  %v177_v13 = vpop.f32.mrf.mxu3 }
 0x127   :  { %v158_v14 = vadd.f32 %v236_v11, %v157_v12 }
 0x129   :  { %v178_v15 = vadd.f32 %v177_v13, %v158_v14 }
 0x12b   :  { %v181_v16 = vmul.f32 1.442695, %v178_v15  ;;  %vm180_vm1 = vcmp.gt.f32.partialorder %v178_v15, 20.0 }
 0x12d   :  { %237 = vpow2.f32 %v181_v16 }
 0x133   :  { %v238_v17 = vpop.eup %237 }
 0x134   :  { %v183_v18 = vadd.f32 1.0, %v238_v17  ;;  %v186_v19 = vmul.f32 -0.5, %v238_v17  ;;  %v189_v21 = vand.u32 2147483647, %v238_v17 }
 0x136   :  { %239 = vlog2.f32 %v183_v18  ;;  %v187_v20 = vadd.f32 1.0, %v186_v19  ;;  %vm190_vm0 = vcmp.lt.f32.partialorder %v189_v21, 0.0004427343 }
 0x138   :  { %v188_v24 = vmul.f32 %v238_v17, %v187_v20 }
 0x13c   :  { %v240_v22 = vpop.eup %239 }
 0x13d   :  { %v185_v23 = vmul.f32 0.6931472, %v240_v22 }
 0x13f   :  { %v191_v26 = vsel %vm190_vm0, %v188_v24, %v185_v23 }
 0x140   :  { %v192_v27 = vsel %vm180_vm1, %v178_v15, %v191_v26 }
 0x141   :  { %v198_v28 = vmul.f32 %v196_v25, %v192_v27  ;;  %241 = vlog2.f32 %v192_v27 }
 0x143   :  { %200 = vrot.lane.b32.xlu0 %v198_v28, %s248_s2 }
 0x147   :  { %v242_v29 = vpop.eup %241 }
 0x148   :  { %v207_v30 = vmul.f32 0.6931472, %v242_v29 }
 0x14a   :  { %209 = vrot.lane.b32.xlu1 %v207_v30, %s248_s2 }
 0x1b5   :  { %v201_v31 = vpop.permute.xlu0 %200 }
 0x1b6   :  { %v203_v32 = vadd.f32 %v201_v31, %v178_v15 }
 0x1b8   :  { %243 = vtanh.f32 %v203_v32 }
 0x1bc   :  { %v210_v39 = vpop.permute.xlu1 %209 }
 0x1bd   :  { %v212_v40 = vsub.f32 %v205_v38, %v210_v39 }
 0x1be   :  { %v244_v33 = vpop.eup %243 }
 0x1bf   :  { %v215_v34 = vmul.f32 %v244_v33, %v244_v33  ;;  %v233_v42 = vadd.f32 -0.9189385, %v212_v40 }
 0x1c1   :  { %v216_v36 = vsub.f32 1.0, %v215_v34 }
 0x1c3   :  { %v217_v37 = vadd.f32 1e-07, %v216_v36 }
 0x1c5   :  { %245 = vlog2.f32 %v217_v37 }
 0x1cb   :  { %v246_v41 = vpop.eup %245 }
 0x1cc   :  { %v219_v43 = vmul.f32 0.6931472, %v246_v41 }
 0x1ce   :  { %v220_v44 = vsub.f32 %v233_v42, %v219_v43 }
 0x1d0   :  { %222 = vrot.lane.b32.xlu1 %v220_v44, %s247_s7 }
 0x242   :  { %v223_v45 = vpop.permute.xlu1 %222 }
 0x243   :  { %v226_v46 = vsel %vm225_vm2, %v244_v33, %v223_v45 }
 0x244   :  { %228 = vst.msk [vmem:[%s499_s6] sm:$0xff] %vm227_vm3, %v226_v46 }

</bundles_post_ra>
